<compile_context>
chip_gen: v5e
topology: v5e:2x2
jax: 0.10.0
libtpu: 0.0.40
codegen_flags: <defaults>
</compile_context>

<pallas_src>
import jax
import jax.numpy as jnp
from jax.experimental import pallas as pl
from jax.experimental.pallas import tpu as pltpu

_LANE = 128
_VMEM_LIMIT = 32 * 1024 * 1024        # scoped VMEM limit, safe on v5e/v6e/v7x
_AGG_BLOCK_BUDGET = 24 * 1024 * 1024  # byte budget for aggregation blocks (v7x guard)
_AGG_ROW_CAP = 1024                   # mem-bound matmul wants 512-1024 row tiles
_AGG_RED_CAP = 512
_STACK_ROW_CAP = 256

_W_FUSED = ('wvd', 'wsp', 'bs', 'wvu', 'wg', 'bg')


def _round_up(x, m):
    return ((x + m - 1) // m) * m


def _cdiv(a, b):
    return (a + b - 1) // b


def _pick_row_tile(n, cap, align):
    """Largest align-ed row tile <= cap that minimizes padding waste."""
    n_al = _round_up(max(n, 1), align)
    ntiles = _cdiv(n_al, cap)
    return _round_up(_cdiv(n, ntiles), align)


# --------------------------------------------------------------------------
# sv_aggregate (agg_reduce='sum'):  out = nb @ [s | v_x | v_y | v_z]
# --------------------------------------------------------------------------
def _agg_kernel(nb_ref, feat_ref, o_ref):
    @pl.when(pl.program_id(1) == 0)
    def _():
        o_ref[...] = jnp.zeros_like(o_ref)

    # bf16 x bf16 on the MXU, f32 accumulation directly in the k-resident output tile.
    o_ref[...] += jnp.dot(nb_ref[...], feat_ref[...],
                          preferred_element_type=jnp.float32)


def _agg_tiles(nt, nf, f_pad):
    nf16 = _round_up(nf, 16)
    if nf16 <= _AGG_RED_CAP:
        tf, nf_pad = nf16, nf16
    else:
        tf, nf_pad = _AGG_RED_CAP, _round_up(nf, _AGG_RED_CAP)
    cap = _AGG_ROW_CAP
    while True:
        tt = _pick_row_tile(nt, cap, 16)
        # double-buffered bf16 input blocks + (up to) double-buffered f32 output block
        vmem = 2 * 2 * (tt * tf + tf * f_pad) + 2 * 4 * tt * f_pad
        if vmem <= _AGG_BLOCK_BUDGET or cap <= 16:
            break
        cap //= 2
    return tt, _round_up(nt, tt), tf, nf_pad


def sv_aggregate_slab(feat_bf16, nb):
    """out[t, :] = sum_f nb[t, f] * feat[f, :].

    feat_bf16 : [Nf, F_pad] bf16 lane-dense slab [s | v_x | v_y | v_z | 0-pad]
    nb        : [Nt, Nf]    neighborhood (0/1 values are exact in bf16)
    returns   : [Nt, F_pad] f32 slab
    """
    nt, nf = nb.shape
    f_pad = feat_bf16.shape[1]
    tt, nt_pad, tf, nf_pad = _agg_tiles(nt, nf, f_pad)

    # cast + pad fuse into a single XLA pass (no-op when already aligned);
    # zero K-padding keeps the reduction exact.
    nb_p = jnp.pad(nb.astype(jnp.bfloat16), ((0, nt_pad - nt), (0, nf_pad - nf)))
    feat_p = jnp.pad(feat_bf16, ((0, nf_pad - nf), (0, 0)))

    out = pl.pallas_call(
        _agg_kernel,
        out_shape=jax.ShapeDtypeStruct((nt_pad, f_pad), jnp.float32),
        grid=(nt_pad // tt, nf_pad // tf),
        in_specs=[pl.BlockSpec((tt, tf), lambda i, k: (i, k)),
                  pl.BlockSpec((tf, f_pad), lambda i, k: (k, 0))],
        out_specs=pl.BlockSpec((tt, f_pad), lambda i, k: (i, 0)),
        compiler_params=pltpu.CompilerParams(
            dimension_semantics=("parallel", "arbitrary"),
            vmem_limit_bytes=_VMEM_LIMIT),
    )(nb_p, feat_p)
    return out[:nt]


# --------------------------------------------------------------------------
# Fused residual TPP stack (+ optional sigmoid attention gate), lane-major.
#   per layer (all tensors [t, *]):
#     vd     = xv @ Wvd                      (block-diag -> one MXU call, [t, 3h])
#     proj_j = sum_d vd[:, d*h:(d+1)h] * F[:, 3j+d]
#     s'     = silu([xs | proj] @ Wsp + b_s) (one fused MXU call)
#     gate   = sigmoid(s' @ W_g + b_g)
#     v'     = (vd @ Wvu) * [gate|gate|gate] (block-diag -> one MXU call, [t, 3V])
#   layer 0 consumes the raw input slab (layout folded into Wvd/Wsp rows);
#   layers 1..depth-1 are residual and run on dense (s, v) kept in registers/VMEM.
# --------------------------------------------------------------------------
def _make_tpp_stack_kernel(num_res, s_out, v_out, apply_attn, out_pad):
    h = v_out

    def kernel(*refs):
        x_ref, f_ref = refs[:2]
        pos = 2
        l0 = refs[pos:pos + 6]
        pos += 6
        lres = None
        if num_res > 0:
            lres = refs[pos:pos + 6]
            pos += 6
        if apply_attn:
            aw_ref, ab_ref = refs[pos:pos + 2]
            pos += 2
        out_ref = refs[pos]

        t = x_ref.shape[0]
        # frame columns hoisted once for the whole residual stack; used via implicit
        # [t,1] x [t,h] broadcasting instead of materializing nine [t,h] buffers.
        f = f_ref[...]
        fcol = [f[:, c:c + 1] for c in range(9)]

        def tpp(xs, xv, wvd, wsp, bs, wvu, wg, bg):
            vd = jnp.dot(xv, wvd, preferred_element_type=jnp.float32)       # [t, 3h]
            vdx, vdy, vdz = vd[:, :h], vd[:, h:2 * h], vd[:, 2 * h:]
            proj = jnp.concatenate(
                [vdx * fcol[3 * j + 0] + vdy * fcol[3 * j + 1] + vdz * fcol[3 * j + 2]
                 for j in range(3)], axis=-1)                               # [t, 3h]
            sp = jnp.concatenate([xs, proj], axis=-1)                       # fused scalar path
            s_new = jax.nn.silu(
                jnp.dot(sp, wsp, preferred_element_type=jnp.float32) + bs)
            gate = jax.nn.sigmoid(
                jnp.dot(s_new, wg, preferred_element_type=jnp.float32) + bg)  # [t, v_out]
            vu = jnp.dot(vd, wvu, preferred_element_type=jnp.float32)         # [t, 3*v_out]
            v_new = vu * jnp.concatenate([gate, gate, gate], axis=-1)
            return s_new, v_new

        x = x_ref[...]
        w0 = [r[...] for r in l0]
        s, v = tpp(x, x, *w0)                     # layer 0 eats the raw input slab
        for l in range(num_res):                  # fused residual layers
            wl = [r[l] for r in lres]
            ds, dv = tpp(s, v, *wl)
            s = s + ds
            v = v + dv

        if apply_attn:                            # fused S_attn gate (VPU + lane reduce)
            att = jax.nn.sigmoid(
                jnp.sum(s * aw_ref[...], axis=-1, keepdims=True) + ab_ref[...])
            s = att * s

        parts = [s, v]
        pad = out_pad - (s_out + 3 * v_out)
        if pad > 0:
            parts.append(jnp.zeros((t, pad), jnp.float32))
        out_ref[...] = jnp.concatenate(parts, axis=-1)   # one 128-aligned lane-dense store

    return kernel


def tpp_stack_apply(x_slab, frame, stack, attn=None):
    """x_slab: [N, A] f32 input slab; frame: [N, 9]. Returns [N, out_pad] f32 slab."""
    n, a_in = x_slab.shape
    s_out, v_out = stack['s_out'], stack['v_out']
    num_res = stack['num_res']
    out_pad = stack['out_pad']
    apply_attn = attn is not None

    # aim for >=2 grid steps so the "parallel" axis can shard across the two v7x
    # TensorCores; on 1-TC chips the extra ~0.35us/step is negligible at these sizes.
    cap = min(_STACK_ROW_CAP, max(8, _round_up(_cdiv(n, 2), 8)))
    t = _pick_row_tile(n, cap, 8)
    n_pad = _round_up(n, t)
    if n_pad != n:
        x_slab = jnp.pad(x_slab, ((0, n_pad - n), (0, 0)))
        frame = jnp.pad(frame, ((0, n_pad - n), (0, 0)))

    def _const_spec(arr):
        nd = arr.ndim
        return pl.BlockSpec(arr.shape, lambda i, _nd=nd: (0,) * _nd)

    inputs = [x_slab, frame]
    in_specs = [pl.BlockSpec((t, a_in), lambda i: (i, 0)),
                pl.BlockSpec((t, 9), lambda i: (i, 0))]
    for k in _W_FUSED:
        inputs.append(stack['l0'][k])
        in_specs.append(_const_spec(stack['l0'][k]))
    if num_res > 0:
        for k in _W_FUSED:
            inputs.append(stack['res'][k])
            in_specs.append(_const_spec(stack['res'][k]))
    if apply_attn:
        inputs += [attn['w'], attn['b']]
        in_specs += [_const_spec(attn['w']), _const_spec(attn['b'])]

    out = pl.pallas_call(
        _make_tpp_stack_kernel(num_res, s_out, v_out, apply_attn, out_pad),
        out_shape=jax.ShapeDtypeStruct((n_pad, out_pad), jnp.float32),
        grid=(n_pad // t,),
        in_specs=in_specs,
        out_specs=pl.BlockSpec((t, out_pad), lambda i: (i, 0)),
        compiler_params=pltpu.CompilerParams(
            dimension_semantics=("parallel",),
            vmem_limit_bytes=_VMEM_LIMIT),
    )(*inputs)
    return out[:n]


# --------------------------------------------------------------------------
# Parameter construction (deterministic, synthetic) + weight fusion
# --------------------------------------------------------------------------
def _init_tpp(key, s_in, v_in, s_out, v_out):
    """Original-shape TPP parameters (GCP-style semantics). h == v_out."""
    h = v_out
    ks = jax.random.split(key, 5)

    def w(k, shape, fan_in):
        return jax.random.normal(k, shape, jnp.float32) / jnp.sqrt(float(fan_in))

    return dict(
        w_vdown=w(ks[0], (v_in, h), v_in),
        w_s_s=w(ks[1], (s_in, s_out), s_in + 3 * h),
        w_s_p=w(ks[2], (3 * h, s_out), s_in + 3 * h),
        b_s=jnp.zeros((1, s_out), jnp.float32),
        w_vup=w(ks[3], (h, v_out), h),
        w_g=w(ks[4], (s_out, v_out), s_out),
        b_g=jnp.zeros((1, v_out), jnp.float32),
    )


def _block_diag3(w):
    k, m = w.shape
    z = jnp.zeros((k, m), w.dtype)
    return jnp.block([[w, z, z], [z, w, z], [z, z, w]])


def _fuse_layer0(p, slab_layout):
    """Embed a TPP layer whose ScalarVector input is the lane-concat of padded
    sub-slabs described by slab_layout = [(S_k, V_k, slab_width_k), ...]."""
    h = p['w_vup'].shape[0]
    s_out = p['w_s_s'].shape[1]
    a_in = sum(w for _, _, w in slab_layout)
    wss = jnp.zeros((a_in, s_out), jnp.float32)
    wvd = jnp.zeros((a_in, 3 * h), jnp.float32)
    col = s_off = v_off = 0
    for (sk, vk, wk) in slab_layout:
        wss = wss.at[col:col + sk].set(p['w_s_s'][s_off:s_off + sk])
        for d in range(3):
            wvd = wvd.at[col + sk + d * vk: col + sk + (d + 1) * vk,
                         d * h:(d + 1) * h].set(p['w_vdown'][v_off:v_off + vk])
        col += wk
        s_off += sk
        v_off += vk
    return dict(
        wvd=wvd,
        wsp=jnp.concatenate([wss, p['w_s_p']], axis=0),
        bs=p['b_s'],
        wvu=_block_diag3(p['w_vup']),
        wg=p['w_g'],
        bg=p['b_g'],
    )


def _fuse_residual(p):
    """Residual layers consume the dense in-kernel (s [t,S], v [t,3V]) activations."""
    return dict(
        wvd=_block_diag3(p['w_vdown']),
        wsp=jnp.concatenate([p['w_s_s'], p['w_s_p']], axis=0),
        bs=p['b_s'],
        wvu=_block_diag3(p['w_vup']),
        wg=p['w_g'],
        bg=p['b_g'],
    )


def _stack_weights(params_list):
    return {k: jnp.stack([p[k] for p in params_list], axis=0) for k in _W_FUSED}


def _make_stack(keys, slab_layout, s_out, v_out, depth):
    s_in = sum(sk for sk, _, _ in slab_layout)
    v_in = sum(vk for _, vk, _ in slab_layout)
    orig = [_init_tpp(next(keys), s_in, v_in, s_out, v_out)]
    orig += [_init_tpp(next(keys), s_out, v_out, s_out, v_out)
             for _ in range(depth - 1)]
    fused_res = [_fuse_residual(p) for p in orig[1:]]
    return dict(
        l0=_fuse_layer0(orig[0], slab_layout),
        res=_stack_weights(fused_res) if fused_res else None,
        num_res=depth - 1,
        s_out=s_out, v_out=v_out,
        out_pad=_round_up(s_out + 3 * v_out, _LANE),
        orig=orig,                       # original shapes, kept for the pure-JAX reference
    )


# --------------------------------------------------------------------------
# slab <-> ScalarVector conversion (module boundary only)
# --------------------------------------------------------------------------
def sv_to_slab(s, v, width):
    """(s [N,S], v [3,N,V]) -> f32 slab [N, width] = [s | vx | vy | vz | 0]."""
    slab = jnp.concatenate([s, v[0], v[1], v[2]], axis=-1)
    return jnp.pad(slab, ((0, 0), (0, width - slab.shape[1])))


def slab_to_sv(slab, s_dim, v_dim):
    n = slab.shape[0]
    s = slab[:, :s_dim]
    v = jnp.transpose(slab[:, s_dim:s_dim + 3 * v_dim].reshape(n, 3, v_dim), (1, 0, 2))
    return s, v


# --------------------------------------------------------------------------
# Module
# --------------------------------------------------------------------------
class GeometricMessagePassingPallas:
    def __init__(self, key, in_dim_dict, out_dim_dict, mapping_dict,
                 agg_reduce='sum', frame_selection='target'):
        assert agg_reduce == 'sum'
        self.in_dim_dict = dict(in_dim_dict)
        self.out_dim_dict = dict(out_dim_dict)
        self.mapping_dict = mapping_dict
        self.frame_selection = frame_selection   # forward uses target frames (as in spec)
        self.slab_width = {r: _round_up(d[0] + 3 * d[1], _LANE)
                           for r, d in self.in_dim_dict.items()}

        self.target_ranks = set()
        self.msg_num_to_rank = {}
        keys = iter(jax.random.split(key, 4096))

        self.W_intra = {}
        for from_rank in mapping_dict:
            for to_rank in mapping_dict[from_rank]:
                self.target_ranks.add(to_rank)
                s_out, v_out = self.out_dim_dict[to_rank]
                layout = [
                    (self.in_dim_dict[from_rank][0], self.in_dim_dict[from_rank][1],
                     self.slab_width[from_rank]),
                    (self.in_dim_dict[to_rank][0], self.in_dim_dict[to_rank][1],
                     self.slab_width[to_rank]),
                ]
                self.W_intra[f'{from_rank}->{to_rank}'] = _make_stack(
                    keys, layout, s_out, v_out, depth=2)
                self.msg_num_to_rank[to_rank] = \
                    self.msg_num_to_rank.get(to_rank, 0) + 1

        self.W_inter = {}
        self.S_attn = {}
        for to_rank in self.target_ranks:
            s_out, v_out = self.out_dim_dict[to_rank]
            msg_pad = _round_up(s_out + 3 * v_out, _LANE)
            layout = [(self.in_dim_dict[to_rank][0], self.in_dim_dict[to_rank][1],
                       self.slab_width[to_rank])]
            layout += [(s_out, v_out, msg_pad)] * self.msg_num_to_rank[to_rank]
            self.W_inter[to_rank] = _make_stack(keys, layout, s_out, v_out, depth=4)
            kw = next(keys)
            self.S_attn[to_rank] = dict(
                w=jax.random.normal(kw, (1, s_out), jnp.float32)
                  / jnp.sqrt(float(s_out)),
                b=jnp.zeros((1, 1), jnp.float32))

    def __call__(self, X_dict, neighborhood_dict, frame_dict):
        # lane-dense slabs built once per rank per call; bf16 copies only for ranks that
        # act as aggregation sources (mask is exact, features lose ~3 decimal digits).
        slab_f32 = {r: sv_to_slab(s, v, self.slab_width[r])
                    for r, (s, v) in X_dict.items()}
        slab_bf16 = {r: slab_f32[r].astype(jnp.bfloat16)
                     for r in self.mapping_dict}

        msg_dict = {k: [] for k in self.target_ranks}
        for from_rank in self.mapping_dict:
            for to_rank in self.mapping_dict[from_rank]:
                nb = neighborhood_dict[f'N{from_rank}_{to_rank}']
                agg = sv_aggregate_slab(slab_bf16[from_rank], nb)          # [Nt, Wfrom]
                x = jnp.concatenate([agg, slab_f32[to_rank]], axis=-1)     # slab concat
                msg = tpp_stack_apply(x, frame_dict[to_rank],
                                      self.W_intra[f'{from_rank}->{to_rank}'])
                msg_dict[to_rank].append(msg)

        update_dict = {}
        for to_rank in msg_dict:
            x = jnp.concatenate([slab_f32[to_rank]] + msg_dict[to_rank], axis=-1)
            out_slab = tpp_stack_apply(x, frame_dict[to_rank],
                                       self.W_inter[to_rank],
                                       attn=self.S_attn[to_rank])
            s_out, v_out = self.out_dim_dict[to_rank]
            update_dict[to_rank] = slab_to_sv(out_slab, s_out, v_out)
        return update_dict


# --------------------------------------------------------------------------
# Pure-JAX reference (same synthetic params, original ScalarVector math)
# --------------------------------------------------------------------------
def _ref_tpp(p, s, v, frame):
    vd = jnp.einsum('dnc,ch->dnh', v, p['w_vdown'])
    fm = frame.reshape(frame.shape[0], 3, 3)
    proj = jnp.einsum('dnh,njd->njh', vd, fm).reshape(s.shape[0], -1)
    s_new = jax.nn.silu(s @ p['w_s_s'] + proj @ p['w_s_p'] + p['b_s'])
    gate = jax.nn.sigmoid(s_new @ p['w_g'] + p['b_g'])
    vu = jnp.einsum('dnh,hv->dnv', vd, p['w_vup'])
    return s_new, vu * gate[None]


def _ref_stack(params, s, v, frame):
    s, v = _ref_tpp(params[0], s, v, frame)
    for p in params[1:]:
        ds, dv = _ref_tpp(p, s, v, frame)
        s, v = s + ds, v + dv
    return s, v


def reference_forward(module, X_dict, neighborhood_dict, frame_dict):
    def r_bf16(x):   # match the kernel's bf16 aggregation inputs
        return x.astype(jnp.bfloat16).astype(jnp.float32)

    msg_dict = {k: [] for k in module.target_ranks}
    for from_rank in module.mapping_dict:
        for to_rank in module.mapping_dict[from_rank]:
            nb = neighborhood_dict[f'N{from_rank}_{to_rank}'].astype(jnp.float32)
            s_f, v_f = X_dict[from_rank]
            agg_s = nb @ r_bf16(s_f)
            agg_v = jnp.einsum('tf,dfc->dtc', nb, r_bf16(v_f))
            s_t, v_t = X_dict[to_rank]
            s = jnp.concatenate([agg_s, s_t], axis=-1)
            v = jnp.concatenate([agg_v, v_t], axis=-1)
            s, v = _ref_stack(module.W_intra[f'{from_rank}->{to_rank}']['orig'],
                              s, v, frame_dict[to_rank])
            msg_dict[to_rank].append((s, v))

    update = {}
    for to_rank in msg_dict:
        s_t, v_t = X_dict[to_rank]
        s = jnp.concatenate([s_t] + [m[0] for m in msg_dict[to_rank]], axis=-1)
        v = jnp.concatenate([v_t] + [m[1] for m in msg_dict[to_rank]], axis=-1)
        s, v = _ref_stack(module.W_inter[to_rank]['orig'], s, v, frame_dict[to_rank])
        a = module.S_attn[to_rank]
        att = jax.nn.sigmoid(jnp.sum(s * a['w'], axis=-1, keepdims=True) + a['b'])
        update[to_rank] = (att * s, v)
    return update


if __name__ == "__main__":
    key = jax.random.PRNGKey(0)
    k_param, k_data = jax.random.split(key)

    # two cell ranks: rank 0 (e.g. nodes), rank 1 (e.g. higher-order cells)
    N = {0: 16, 1: 8}
    dims = {0: (32, 8), 1: (16, 4)}          # (scalar_dim, vector_channels)
    mapping_dict = {0: [1], 1: [0]}

    ks = jax.random.split(k_data, 16)
    X_dict, frame_dict = {}, {}
    for i, r in enumerate((0, 1)):
        s = jax.random.normal(ks[4 * i], (N[r], dims[r][0]), jnp.float32)
        v = jax.random.normal(ks[4 * i + 1], (N[r], dims[r][1], 3), jnp.float32)
        X_dict[r] = (s, jnp.transpose(v, (2, 0, 1)))           # vectors: [3, N, V]
        f = jax.random.normal(ks[4 * i + 2], (N[r], 3, 3), jnp.float32)
        frame_dict[r] = f.reshape(N[r], 9)                      # [N, 9]

    neighborhood_dict = {
        'N0_1': (jax.random.uniform(ks[8], (N[1], N[0])) > 0.5).astype(jnp.float32),
        'N1_0': (jax.random.uniform(ks[9], (N[0], N[1])) > 0.5).astype(jnp.float32),
    }

    module = GeometricMessagePassingPallas(
        k_param, in_dim_dict=dims, out_dim_dict=dims,
        mapping_dict=mapping_dict, agg_reduce='sum', frame_selection='target')

    out = module(X_dict, neighborhood_dict, frame_dict)
    out = jax.tree_util.tree_map(jax.block_until_ready, out)

    with jax.default_matmul_precision("highest"):
        ref = reference_forward(module, X_dict, neighborhood_dict, frame_dict)
    ref = jax.tree_util.tree_map(jax.block_until_ready, ref)

    for r in out:
        s_k, v_k = out[r]
        s_r, v_r = ref[r]
        assert s_k.shape == (N[r], dims[r][0]) and v_k.shape == (3, N[r], dims[r][1])
        assert bool(jnp.all(jnp.isfinite(s_k))) and bool(jnp.all(jnp.isfinite(v_k)))
        assert bool(jnp.allclose(s_k, s_r, rtol=5e-2, atol=5e-2)), \
            f"scalar mismatch rank {r}: {jnp.max(jnp.abs(s_k - s_r))}"
        assert bool(jnp.allclose(v_k, v_r, rtol=5e-2, atol=5e-2)), \
            f"vector mismatch rank {r}: {jnp.max(jnp.abs(v_k - v_r))}"

    print("KERNEL_OK")
</pallas_src>

<mosaic_0001>
module attributes {stable_mosaic.version = 11 : i64} {
  func.func @_agg_kernel(%arg0: i32, %arg1: i32, %arg2: memref<16x16xbf16, #tpu.memory_space<vmem>>, %arg3: memref<16x128xbf16, #tpu.memory_space<vmem>>, %arg4: memref<16x128xf32, #tpu.memory_space<vmem>>) attributes {dimension_semantics = [#tpu.dimension_semantics<parallel>, #tpu.dimension_semantics<arbitrary>], iteration_bounds = array<i64: 1, 1>, scalar_prefetch = 0 : i64, scratch_operands = 0 : i64, tpu.core_type = #tpu.core_type<tc>, window_params = [{transform_indices = @transform_0, window_bounds = array<i64: 16, 16>}, {transform_indices = @transform_1, window_bounds = array<i64: 16, 128>}, {transform_indices = @transform_2, window_bounds = array<i64: 16, 128>}]} {
    %c0_i32 = arith.constant 0 : i32
    %0 = arith.cmpi eq, %arg1, %c0_i32 : i32
    %1 = arith.extui %0 : i1 to i32
    %c0_i32_0 = arith.constant 0 : i32
    %2 = arith.cmpi ne, %1, %c0_i32_0 : i32
    scf.if %2 {
      %cst_8 = arith.constant 0.000000e+00 : f32
      %9 = vector.broadcast %cst_8 : f32 to vector<16x128xf32>
      %c0_9 = arith.constant 0 : index
      %c0_10 = arith.constant 0 : index
      %10 = vector.load %arg4[%c0_9, %c0_10] : memref<16x128xf32, #tpu.memory_space<vmem>>, vector<16x128xf32>
      tpu.vector_store %arg4[%c0_9, %c0_10], %9 {strides = array<i32>} : memref<16x128xf32, #tpu.memory_space<vmem>>, vector<16x128xf32>,
    } else {
    }
    %c0 = arith.constant 0 : index
    %c0_1 = arith.constant 0 : index
    %3 = vector.load %arg4[%c0, %c0_1] : memref<16x128xf32, #tpu.memory_space<vmem>>, vector<16x128xf32>
    %c0_2 = arith.constant 0 : index
    %c0_3 = arith.constant 0 : index
    %4 = vector.load %arg2[%c0_2, %c0_3] : memref<16x16xbf16, #tpu.memory_space<vmem>>, vector<16x16xbf16>
    %c0_4 = arith.constant 0 : index
    %c0_5 = arith.constant 0 : index
    %5 = vector.load %arg3[%c0_4, %c0_5] : memref<16x128xbf16, #tpu.memory_space<vmem>>, vector<16x128xbf16>
    %cst = arith.constant dense<0.000000e+00> : vector<16x128xf32>
    %6 = tpu.matmul %4, %5, %cst {dimension_numbers = #tpu.dot_dimension_numbers<[1], [0], [0], [1], [0, 0, 1, 1], [], []>} : vector<16x16xbf16>, vector<16x128xbf16>, vector<16x128xf32> -> vector<16x128xf32>
    %7 = arith.addf %3, %6 : vector<16x128xf32>
    %c0_6 = arith.constant 0 : index
    %c0_7 = arith.constant 0 : index
    %8 = vector.load %arg4[%c0_6, %c0_7] : memref<16x128xf32, #tpu.memory_space<vmem>>, vector<16x128xf32>
    tpu.vector_store %arg4[%c0_6, %c0_7], %7 {strides = array<i32>} : memref<16x128xf32, #tpu.memory_space<vmem>>, vector<16x128xf32>,
    return
  }
  func.func @transform_0(%arg0: i32, %arg1: i32) -> (i32, i32) {
    %c0_i32 = arith.constant 0 : i32
    return %arg0, %arg1 : i32, i32
  }
  func.func @transform_1(%arg0: i32, %arg1: i32) -> (i32, i32) {
    %c0_i32 = arith.constant 0 : i32
    %c0_i32_0 = arith.constant 0 : i32
    return %arg1, %c0_i32 : i32, i32
  }
  func.func @transform_2(%arg0: i32, %arg1: i32) -> (i32, i32) {
    %c0_i32 = arith.constant 0 : i32
    %c0_i32_0 = arith.constant 0 : i32
    return %arg0, %c0_i32 : i32, i32
  }
}

</mosaic_0001>

<bundles_post_ra>
// kernel: tpu_custom_call.1
= control target key start
LH: loop header
LB: loop body
LE: loop exit
PB: predicated region body
PF: predicated region fallthrough
CT: control target
= control target key end

     0   :  { %7 = vsyncpa [#allocation3], 0  ;;  %s238_s0 = inlined_call_operand.hbm [shape: bf16[16,16], index: 0, kind: input, shape index: {}]   ;;  %s239_s1 = inlined_call_operand.hbm [shape: bf16[16,128], index: 1, kind: input, shape index: {}]   ;;  %s240_s2 = inlined_call_operand.hbm [shape: f32[16,128], index: 2, kind: output, shape index: {}]  }
   0x1   :  { %8 = vsyncpa [#allocation6], 0 }
   0x2   :  { %9 = vsyncpa [#allocation4], 0  ;;  %s14_s11 = sshll.u32 %s238_s0, 4  ;;  %s207_s12 = smov [#allocation2]   ;;  %s15_s11 = int_to_ptr.hbm [resolvable:$true] %s14_s11 }
   0x3   :  { %s16_s13 = sshll.u32 %s207_s12, 4  ;;  %s27_s16 = sshll.u32 %s239_s1, 4  ;;  %s17_s13 = int_to_ptr.vmem [resolvable:$true] %s16_s13  ;;  %s28_s16 = int_to_ptr.hbm [resolvable:$true] %s27_s16 }
   0x4   :  { %s208_s17 = smov 64   ;;  %s209_s18 = smov 4  }
   0x5   :  { %22 = dma.hbm_to_vmem [thread:$0]  %s15_s11, 128, %s17_s13, [#allocation3], %s208_s17, %s208_s17, %s209_s18  }
   0x6   :  { %s210_s19 = smov [#allocation5]  }
   0x7   :  { %s29_s20 = sshll.u32 %s210_s19, 4  ;;  %s30_s20 = int_to_ptr.vmem [resolvable:$true] %s29_s20 }
   0x8   :  { %35 = dma.hbm_to_vmem [thread:$0]  %s28_s16, 128, %s30_s20, [#allocation6], %s208_s17, %s208_s17, %s209_s18  }
   0x9   :  { %201 = dma.done.wait [#allocation3], 128  }
   0xa   :  { %202 = vsyncadd [#allocation3], 4294967168 }
   0xb   :  { %203 = dma.done.wait [#allocation6], 128  }
   0xc   :  { %204 = vsyncadd [#allocation6], 4294967168  ;;  %v120_v0 = vld [vmem:[#allocation5] sm:$0xff]  ;;  %v119_v1 = vld [vmem:[#allocation2] sm:$0xff]  ;;  %vm68_vm0 = vcmask 130048   ;;  %s211_s0 = smov [#allocation7]  }
   0xd   :  { %79 = vmatpush.bf16.msra.mxu0 %v120_v0  ;;  %s94_s1 = sshll.u32 %s211_s0, 4  ;;  %s96_s23 = sshll.u32 %s240_s2, 4  ;;  %s95_s1 = int_to_ptr.vmem [resolvable:$true] %s94_s1  ;;  %s97_s23 = int_to_ptr.hbm [resolvable:$true] %s96_s23 }
   0xe   :  { %s212_s24 = smov 128   ;;  %s213_s25 = smov 8  }
  0x10   :  { %118 = vmatmul.msk.bf16.vlgmr.msra.gmra.mxu0 %vm68_vm0, %v119_v1 }
  0x8d   :  { %v81_v2 = vpop.f32.mrf.mxu0 }
  0x8e   :  { %88 = vst [vmem:[#allocation7] sm:$0xff] %v81_v2 }
  0x95   :  { %v83_v3 = vpop.f32.mrf.mxu0 }
  0x96   :  { %89 = vst [vmem:[#allocation7 + $0x8] sm:$0xff] %v83_v3 }
  0x97   :  { %102 = dma.vmem_to_hbm [thread:$0]  %s95_s1, 256, %s97_s23, [#allocation4], %s212_s24, %s212_s24, %s213_s25  }
  0x98   :  { %205 = dma.done.wait [#allocation4], 256  }
  0x99   :  { %206 = vsyncadd [#allocation4], 4294967040 }
  0x9a   :  { %107 = vsyncpa [#allocation3], 1 }
  0x9b   :  { %108 = vsyncpa [#allocation6], 1 }
  0x9c   :  { %109 = vsyncpa [#allocation4], 1 }

</bundles_post_ra>
